<compile_context>
chip_gen: v5e
topology: v5e:2x2
jax: 0.10.0
libtpu: 0.0.40
codegen_flags: <defaults>
</compile_context>

<pallas_src>
import math

import jax
import jax.numpy as jnp
from jax.experimental import pallas as pl
from jax.experimental.pallas import tpu as pltpu

# ----------------------------- config (small, deterministic) -----------------
BATCH = 2
SEQ = 8
EMBED = 32
NUM_HEADS = 4
HEAD_DIM = EMBED // NUM_HEADS
HIDDEN = 4 * EMBED
LN_EPS = 1e-5


def _layer_norm(x, gamma, beta, eps=LN_EPS):
    mu = jnp.mean(x, axis=-1, keepdims=True)
    var = jnp.mean((x - mu) ** 2, axis=-1, keepdims=True)
    return (x - mu) * jax.lax.rsqrt(var + eps) * gamma + beta


def _gelu_exact(x):
    # nn.GELU() default = exact erf formulation
    return 0.5 * x * (1.0 + jax.lax.erf(x * (1.0 / math.sqrt(2.0))))


# ----------------------------- the Pallas kernel ------------------------------
def gpt_block_kernel(
    x_ref,        # (B*S, E)   f32
    wqkv_ref,     # (E, 3E)    bf16  (fused Wq|Wk|Wv)
    wo_ref,       # (E, E)     bf16
    w1_ref,       # (E, H)     bf16
    w2_ref,       # (H, E)     bf16
    bqkv_ref,     # (1, 3E)    f32
    b1_ref,       # (1, H)     f32
    vec_ref,      # (8, E)     f32   rows: [bo, g1, be1, b2, g2, be2, pad, pad]
    o_ref,        # (B*S, E)   f32
):
    x = x_ref[...]                                            # (B*S, E) f32

    # --- fused QKV projection: one MXU push instead of three ------------------
    qkv = jnp.dot(x.astype(jnp.bfloat16), wqkv_ref[...],
                  preferred_element_type=jnp.float32) + bqkv_ref[...]   # (B*S, 3E)
    # Split the leading (sublane) dim back into (B, S); minor dim untouched -> free.
    qkv3 = qkv.reshape(BATCH, SEQ, 3 * EMBED)

    scale = 1.0 / math.sqrt(HEAD_DIM)
    attn = jnp.zeros((BATCH * SEQ, EMBED), jnp.float32)
    for h in range(NUM_HEADS):  # static unrolled loop; NUM_HEADS = 4
        q3 = qkv3[:, :, h * HEAD_DIM:(h + 1) * HEAD_DIM]                    # (B,S,D)
        k3 = qkv3[:, :, EMBED + h * HEAD_DIM:EMBED + (h + 1) * HEAD_DIM]
        v3 = qkv3[:, :, 2 * EMBED + h * HEAD_DIM:2 * EMBED + (h + 1) * HEAD_DIM]

        # batched over B in a single contraction (MXU, bf16 in / f32 acc)
        s = jnp.einsum("bqd,bkd->bqk",
                       q3.astype(jnp.bfloat16), k3.astype(jnp.bfloat16),
                       preferred_element_type=jnp.float32) * scale          # (B,S,S)
        s = s - jnp.max(s, axis=-1, keepdims=True)
        p = jnp.exp(s)
        p = p * pl.reciprocal(jnp.sum(p, axis=-1, keepdims=True), approx=True)

        o3 = jnp.einsum("bqk,bkd->bqd",
                        p.astype(jnp.bfloat16), v3.astype(jnp.bfloat16),
                        preferred_element_type=jnp.float32)                 # (B,S,D)
        o2 = o3.reshape(BATCH * SEQ, HEAD_DIM)                              # free merge

        # Accumulate this head directly through its slice of Wo: avoids the
        # 8-lane concatenate (sub-tile relayout) of the previous version.
        attn = attn + jnp.dot(o2.astype(jnp.bfloat16),
                              wo_ref[h * HEAD_DIM:(h + 1) * HEAD_DIM, :],
                              preferred_element_type=jnp.float32)

    attn = attn + vec_ref[0:1, :]                             # + bo

    # --- residual + LN1 (f32 elementwise path) --------------------------------
    y = _layer_norm(x + attn, vec_ref[1:2, :], vec_ref[2:3, :])

    # --- feed-forward (Linear -> GELU -> Linear) -------------------------------
    h1 = jnp.dot(y.astype(jnp.bfloat16), w1_ref[...],
                 preferred_element_type=jnp.float32) + b1_ref[...]
    h1 = _gelu_exact(h1)
    h2 = jnp.dot(h1.astype(jnp.bfloat16), w2_ref[...],
                 preferred_element_type=jnp.float32) + vec_ref[3:4, :]

    # --- residual + LN2 --------------------------------------------------------
    # TODO(synk): output last dim is E=32 (< 128 lanes) -> masked stores; a lane-dense
    # (B, S*E) store would need an in-kernel minor-dim reshape (skipped for robustness).
    o_ref[...] = _layer_norm(y + h2, vec_ref[4:5, :], vec_ref[5:6, :])


# ----------------------------- host wrapper ----------------------------------
def gpt_block_pallas(x, params):
    B, S, E = x.shape
    x2 = x.reshape(B * S, E)                                  # host-side, free

    # Fuse / pack parameters (fewer, larger DMAs into VMEM).
    wqkv = jnp.concatenate(
        [params["wq"], params["wk"], params["wv"]], axis=1).astype(jnp.bfloat16)
    bqkv = jnp.concatenate([params["bq"], params["bk"], params["bv"]], axis=1)
    wo = params["wo"].astype(jnp.bfloat16)
    w1 = params["w1"].astype(jnp.bfloat16)
    w2 = params["w2"].astype(jnp.bfloat16)
    b1 = params["b1"]
    vecs = jnp.concatenate(
        [params["bo"], params["g1"], params["be1"],
         params["b2"], params["g2"], params["be2"],
         jnp.zeros((2, E), jnp.float32)], axis=0)             # (8, E)

    vmem = pl.BlockSpec(memory_space=pltpu.MemorySpace.VMEM)

    # TODO(synk): on v7x (2 TensorCores) the batch could be split across cores via a
    # parallel grid axis; with B=2 at this size the single-invocation form is faster.
    out2 = pl.pallas_call(
        gpt_block_kernel,
        out_shape=jax.ShapeDtypeStruct((B * S, E), jnp.float32),
        in_specs=[vmem] * 8,
        out_specs=vmem,
    )(x2, wqkv, wo, w1, w2, bqkv, b1, vecs)

    return out2.reshape(B, S, E)


# ----------------------------- pure-JAX reference -----------------------------
def gpt_block_ref(x, p):
    q = x @ p["wq"] + p["bq"]
    k = x @ p["wk"] + p["bk"]
    v = x @ p["wv"] + p["bv"]
    B, S, E = x.shape
    q = q.reshape(B, S, NUM_HEADS, HEAD_DIM).transpose(0, 2, 1, 3)
    k = k.reshape(B, S, NUM_HEADS, HEAD_DIM).transpose(0, 2, 1, 3)
    v = v.reshape(B, S, NUM_HEADS, HEAD_DIM).transpose(0, 2, 1, 3)
    s = jnp.einsum("bhqd,bhkd->bhqk", q, k) / math.sqrt(HEAD_DIM)
    p_attn = jax.nn.softmax(s, axis=-1)
    o = jnp.einsum("bhqk,bhkd->bhqd", p_attn, v)
    o = o.transpose(0, 2, 1, 3).reshape(B, S, E)
    attn = o @ p["wo"] + p["bo"]
    y = _layer_norm(x + attn, p["g1"], p["be1"])
    h = _gelu_exact(y @ p["w1"] + p["b1"]) @ p["w2"] + p["b2"]
    return _layer_norm(y + h, p["g2"], p["be2"])


# ----------------------------- params ----------------------------------------
def init_params(key):
    ks = jax.random.split(key, 8)
    std = 0.02
    return {
        # attention in-projection (already transposed: E x E so kernel does x @ W)
        "wq": jax.random.normal(ks[0], (EMBED, EMBED), jnp.float32) * std,
        "wk": jax.random.normal(ks[1], (EMBED, EMBED), jnp.float32) * std,
        "wv": jax.random.normal(ks[2], (EMBED, EMBED), jnp.float32) * std,
        "bq": jax.random.normal(ks[3], (1, EMBED), jnp.float32) * std,
        "bk": jnp.zeros((1, EMBED), jnp.float32),
        "bv": jnp.zeros((1, EMBED), jnp.float32),
        # attention out-projection
        "wo": jax.random.normal(ks[4], (EMBED, EMBED), jnp.float32) * std,
        "bo": jnp.zeros((1, EMBED), jnp.float32),
        # LayerNorm 1
        "g1": jnp.ones((1, EMBED), jnp.float32),
        "be1": jnp.zeros((1, EMBED), jnp.float32),
        # feed-forward
        "w1": jax.random.normal(ks[5], (EMBED, HIDDEN), jnp.float32) * std,
        "b1": jax.random.normal(ks[6], (1, HIDDEN), jnp.float32) * std,
        "w2": jax.random.normal(ks[7], (HIDDEN, EMBED), jnp.float32) * std,
        "b2": jnp.zeros((1, EMBED), jnp.float32),
        # LayerNorm 2
        "g2": jnp.ones((1, EMBED), jnp.float32),
        "be2": jnp.zeros((1, EMBED), jnp.float32),
    }


if __name__ == "__main__":
    key = jax.random.PRNGKey(0)
    kx, kp = jax.random.split(key)
    x = jax.random.normal(kx, (BATCH, SEQ, EMBED), jnp.float32)
    params = init_params(kp)

    # TODO(synk): attn_mask / dropout are not modeled (attn_mask=None, eval-mode dropout).
    out = gpt_block_pallas(x, params)
    out = jax.block_until_ready(out)

    ref = gpt_block_ref(x, params)
    assert out.shape == (BATCH, SEQ, EMBED)
    assert jnp.allclose(out, ref, atol=2e-2, rtol=2e-2), (
        f"max abs diff {float(jnp.max(jnp.abs(out - ref)))}"
    )
    print("KERNEL_OK")
</pallas_src>

<mosaic_0001>
module attributes {stable_mosaic.version = 11 : i64} {
  func.func @gpt_block_kernel(%arg0: memref<16x32xf32, #tpu.memory_space<vmem>>, %arg1: memref<32x96xbf16, #tpu.memory_space<vmem>>, %arg2: memref<32x32xbf16, #tpu.memory_space<vmem>>, %arg3: memref<32x128xbf16, #tpu.memory_space<vmem>>, %arg4: memref<128x32xbf16, #tpu.memory_space<vmem>>, %arg5: memref<1x96xf32, #tpu.memory_space<vmem>>, %arg6: memref<1x128xf32, #tpu.memory_space<vmem>>, %arg7: memref<8x32xf32, #tpu.memory_space<vmem>>, %arg8: memref<16x32xf32, #tpu.memory_space<vmem>>) attributes {dimension_semantics = [], scalar_prefetch = 0 : i64, scratch_operands = 0 : i64, tpu.core_type = #tpu.core_type<tc>} {
    %c0 = arith.constant 0 : index
    %c0_0 = arith.constant 0 : index
    %0 = vector.load %arg0[%c0, %c0_0] : memref<16x32xf32, #tpu.memory_space<vmem>>, vector<16x32xf32>
    %1 = arith.truncf %0 : vector<16x32xf32> to vector<16x32xbf16>
    %c0_1 = arith.constant 0 : index
    %c0_2 = arith.constant 0 : index
    %2 = vector.load %arg1[%c0_1, %c0_2] : memref<32x96xbf16, #tpu.memory_space<vmem>>, vector<32x96xbf16>
    %cst = arith.constant dense<0.000000e+00> : vector<16x96xf32>
    %3 = tpu.matmul %1, %2, %cst {dimension_numbers = #tpu.dot_dimension_numbers<[1], [0], [0], [1], [0, 0, 1, 1], [], []>} : vector<16x32xbf16>, vector<32x96xbf16>, vector<16x96xf32> -> vector<16x96xf32>
    %c0_3 = arith.constant 0 : index
    %c0_4 = arith.constant 0 : index
    %4 = vector.load %arg5[%c0_3, %c0_4] : memref<1x96xf32, #tpu.memory_space<vmem>>, vector<1x96xf32>
    %5 = vector.broadcast %4 : vector<1x96xf32> to vector<16x96xf32>
    %6 = arith.addf %3, %5 : vector<16x96xf32>
    %7 = vector.shape_cast %6 : vector<16x96xf32> to vector<2x8x96xf32>
    %cst_5 = arith.constant 0.000000e+00 : f32
    %8 = vector.broadcast %cst_5 : f32 to vector<16x32xf32>
    %9 = vector.extract_strided_slice %7 {offsets = [0, 0, 0], sizes = [2, 8, 8], strides = [1, 1, 1]} : vector<2x8x96xf32> to vector<2x8x8xf32>
    %10 = vector.extract_strided_slice %7 {offsets = [0, 0, 32], sizes = [2, 8, 8], strides = [1, 1, 1]} : vector<2x8x96xf32> to vector<2x8x8xf32>
    %11 = vector.extract_strided_slice %7 {offsets = [0, 0, 64], sizes = [2, 8, 8], strides = [1, 1, 1]} : vector<2x8x96xf32> to vector<2x8x8xf32>
    %12 = arith.truncf %9 : vector<2x8x8xf32> to vector<2x8x8xbf16>
    %13 = arith.truncf %10 : vector<2x8x8xf32> to vector<2x8x8xbf16>
    "tpu.trace_start"() <{level = 10 : i32, message = "bqd,bkd->bqk"}> : () -> ()
    %cst_6 = arith.constant dense<0.000000e+00> : vector<2x8x8xf32>
    %14 = tpu.matmul %12, %13, %cst_6 {dimension_numbers = #tpu.dot_dimension_numbers<[2], [2], [1], [1], [0, 0, 0, 1, 1, 1], [0], [0]>} : vector<2x8x8xbf16>, vector<2x8x8xbf16>, vector<2x8x8xf32> -> vector<2x8x8xf32>
    "tpu.trace_stop"() : () -> ()
    %cst_7 = arith.constant 0.353553385 : f32
    %15 = vector.broadcast %cst_7 : f32 to vector<2x8x8xf32>
    %16 = arith.mulf %14, %15 : vector<2x8x8xf32>
    %cst_8 = arith.constant dense<0xFF800000> : vector<2x8xf32>
    %17 = vector.multi_reduction <maximumf>, %16, %cst_8 [2] : vector<2x8x8xf32> to vector<2x8xf32>
    %18 = vector.shape_cast %17 : vector<2x8xf32> to vector<2x8x1xf32>
    %19 = vector.broadcast %18 : vector<2x8x1xf32> to vector<2x8x8xf32>
    %20 = arith.subf %16, %19 : vector<2x8x8xf32>
    %21 = math.exp %20 : vector<2x8x8xf32>
    %cst_9 = arith.constant dense<0.000000e+00> : vector<2x8xf32>
    %22 = vector.multi_reduction <add>, %21, %cst_9 [2] : vector<2x8x8xf32> to vector<2x8xf32>
    %23 = vector.shape_cast %22 : vector<2x8xf32> to vector<2x8x1xf32>
    %24 = tpu.reciprocal %23 {approx = true} : vector<2x8x1xf32> -> vector<2x8x1xf32>
    %25 = vector.broadcast %24 : vector<2x8x1xf32> to vector<2x8x8xf32>
    %26 = arith.mulf %21, %25 : vector<2x8x8xf32>
    %27 = arith.truncf %26 : vector<2x8x8xf32> to vector<2x8x8xbf16>
    %28 = arith.truncf %11 : vector<2x8x8xf32> to vector<2x8x8xbf16>
    "tpu.trace_start"() <{level = 10 : i32, message = "bqk,bkd->bqd"}> : () -> ()
    %cst_10 = arith.constant dense<0.000000e+00> : vector<2x8x8xf32>
    %29 = tpu.matmul %27, %28, %cst_10 {dimension_numbers = #tpu.dot_dimension_numbers<[2], [1], [1], [2], [0, 0, 0, 1, 1, 2], [0], [0]>} : vector<2x8x8xbf16>, vector<2x8x8xbf16>, vector<2x8x8xf32> -> vector<2x8x8xf32>
    "tpu.trace_stop"() : () -> ()
    %30 = vector.shape_cast %29 : vector<2x8x8xf32> to vector<16x8xf32>
    %31 = arith.truncf %30 : vector<16x8xf32> to vector<16x8xbf16>
    %c0_11 = arith.constant 0 : index
    %c0_12 = arith.constant 0 : index
    %32 = vector.load %arg2[%c0_11, %c0_12] : memref<32x32xbf16, #tpu.memory_space<vmem>>, vector<8x32xbf16>
    %cst_13 = arith.constant dense<0.000000e+00> : vector<16x32xf32>
    %33 = tpu.matmul %31, %32, %cst_13 {dimension_numbers = #tpu.dot_dimension_numbers<[1], [0], [0], [1], [0, 0, 1, 1], [], []>} : vector<16x8xbf16>, vector<8x32xbf16>, vector<16x32xf32> -> vector<16x32xf32>
    %34 = arith.addf %8, %33 : vector<16x32xf32>
    %35 = vector.extract_strided_slice %7 {offsets = [0, 0, 8], sizes = [2, 8, 8], strides = [1, 1, 1]} : vector<2x8x96xf32> to vector<2x8x8xf32>
    %36 = vector.extract_strided_slice %7 {offsets = [0, 0, 40], sizes = [2, 8, 8], strides = [1, 1, 1]} : vector<2x8x96xf32> to vector<2x8x8xf32>
    %37 = vector.extract_strided_slice %7 {offsets = [0, 0, 72], sizes = [2, 8, 8], strides = [1, 1, 1]} : vector<2x8x96xf32> to vector<2x8x8xf32>
    %38 = arith.truncf %35 : vector<2x8x8xf32> to vector<2x8x8xbf16>
    %39 = arith.truncf %36 : vector<2x8x8xf32> to vector<2x8x8xbf16>
    "tpu.trace_start"() <{level = 10 : i32, message = "bqd,bkd->bqk"}> : () -> ()
    %cst_14 = arith.constant dense<0.000000e+00> : vector<2x8x8xf32>
    %40 = tpu.matmul %38, %39, %cst_14 {dimension_numbers = #tpu.dot_dimension_numbers<[2], [2], [1], [1], [0, 0, 0, 1, 1, 1], [0], [0]>} : vector<2x8x8xbf16>, vector<2x8x8xbf16>, vector<2x8x8xf32> -> vector<2x8x8xf32>
    "tpu.trace_stop"() : () -> ()
    %cst_15 = arith.constant 0.353553385 : f32
    %41 = vector.broadcast %cst_15 : f32 to vector<2x8x8xf32>
    %42 = arith.mulf %40, %41 : vector<2x8x8xf32>
    %cst_16 = arith.constant dense<0xFF800000> : vector<2x8xf32>
    %43 = vector.multi_reduction <maximumf>, %42, %cst_16 [2] : vector<2x8x8xf32> to vector<2x8xf32>
    %44 = vector.shape_cast %43 : vector<2x8xf32> to vector<2x8x1xf32>
    %45 = vector.broadcast %44 : vector<2x8x1xf32> to vector<2x8x8xf32>
    %46 = arith.subf %42, %45 : vector<2x8x8xf32>
    %47 = math.exp %46 : vector<2x8x8xf32>
    %cst_17 = arith.constant dense<0.000000e+00> : vector<2x8xf32>
    %48 = vector.multi_reduction <add>, %47, %cst_17 [2] : vector<2x8x8xf32> to vector<2x8xf32>
    %49 = vector.shape_cast %48 : vector<2x8xf32> to vector<2x8x1xf32>
    %50 = tpu.reciprocal %49 {approx = true} : vector<2x8x1xf32> -> vector<2x8x1xf32>
    %51 = vector.broadcast %50 : vector<2x8x1xf32> to vector<2x8x8xf32>
    %52 = arith.mulf %47, %51 : vector<2x8x8xf32>
    %53 = arith.truncf %52 : vector<2x8x8xf32> to vector<2x8x8xbf16>
    %54 = arith.truncf %37 : vector<2x8x8xf32> to vector<2x8x8xbf16>
    "tpu.trace_start"() <{level = 10 : i32, message = "bqk,bkd->bqd"}> : () -> ()
    %cst_18 = arith.constant dense<0.000000e+00> : vector<2x8x8xf32>
    %55 = tpu.matmul %53, %54, %cst_18 {dimension_numbers = #tpu.dot_dimension_numbers<[2], [1], [1], [2], [0, 0, 0, 1, 1, 2], [0], [0]>} : vector<2x8x8xbf16>, vector<2x8x8xbf16>, vector<2x8x8xf32> -> vector<2x8x8xf32>
    "tpu.trace_stop"() : () -> ()
    %56 = vector.shape_cast %55 : vector<2x8x8xf32> to vector<16x8xf32>
    %57 = arith.truncf %56 : vector<16x8xf32> to vector<16x8xbf16>
    %c8 = arith.constant 8 : index
    %c0_19 = arith.constant 0 : index
    %58 = vector.load %arg2[%c8, %c0_19] : memref<32x32xbf16, #tpu.memory_space<vmem>>, vector<8x32xbf16>
    %cst_20 = arith.constant dense<0.000000e+00> : vector<16x32xf32>
    %59 = tpu.matmul %57, %58, %cst_20 {dimension_numbers = #tpu.dot_dimension_numbers<[1], [0], [0], [1], [0, 0, 1, 1], [], []>} : vector<16x8xbf16>, vector<8x32xbf16>, vector<16x32xf32> -> vector<16x32xf32>
    %60 = arith.addf %34, %59 : vector<16x32xf32>
    %61 = vector.extract_strided_slice %7 {offsets = [0, 0, 16], sizes = [2, 8, 8], strides = [1, 1, 1]} : vector<2x8x96xf32> to vector<2x8x8xf32>
    %62 = vector.extract_strided_slice %7 {offsets = [0, 0, 48], sizes = [2, 8, 8], strides = [1, 1, 1]} : vector<2x8x96xf32> to vector<2x8x8xf32>
    %63 = vector.extract_strided_slice %7 {offsets = [0, 0, 80], sizes = [2, 8, 8], strides = [1, 1, 1]} : vector<2x8x96xf32> to vector<2x8x8xf32>
    %64 = arith.truncf %61 : vector<2x8x8xf32> to vector<2x8x8xbf16>
    %65 = arith.truncf %62 : vector<2x8x8xf32> to vector<2x8x8xbf16>
    "tpu.trace_start"() <{level = 10 : i32, message = "bqd,bkd->bqk"}> : () -> ()
    %cst_21 = arith.constant dense<0.000000e+00> : vector<2x8x8xf32>
    %66 = tpu.matmul %64, %65, %cst_21 {dimension_numbers = #tpu.dot_dimension_numbers<[2], [2], [1], [1], [0, 0, 0, 1, 1, 1], [0], [0]>} : vector<2x8x8xbf16>, vector<2x8x8xbf16>, vector<2x8x8xf32> -> vector<2x8x8xf32>
    "tpu.trace_stop"() : () -> ()
    %cst_22 = arith.constant 0.353553385 : f32
    %67 = vector.broadcast %cst_22 : f32 to vector<2x8x8xf32>
    %68 = arith.mulf %66, %67 : vector<2x8x8xf32>
    %cst_23 = arith.constant dense<0xFF800000> : vector<2x8xf32>
    %69 = vector.multi_reduction <maximumf>, %68, %cst_23 [2] : vector<2x8x8xf32> to vector<2x8xf32>
    %70 = vector.shape_cast %69 : vector<2x8xf32> to vector<2x8x1xf32>
    %71 = vector.broadcast %70 : vector<2x8x1xf32> to vector<2x8x8xf32>
    %72 = arith.subf %68, %71 : vector<2x8x8xf32>
    %73 = math.exp %72 : vector<2x8x8xf32>
    %cst_24 = arith.constant dense<0.000000e+00> : vector<2x8xf32>
    %74 = vector.multi_reduction <add>, %73, %cst_24 [2] : vector<2x8x8xf32> to vector<2x8xf32>
    %75 = vector.shape_cast %74 : vector<2x8xf32> to vector<2x8x1xf32>
    %76 = tpu.reciprocal %75 {approx = true} : vector<2x8x1xf32> -> vector<2x8x1xf32>
    %77 = vector.broadcast %76 : vector<2x8x1xf32> to vector<2x8x8xf32>
    %78 = arith.mulf %73, %77 : vector<2x8x8xf32>
    %79 = arith.truncf %78 : vector<2x8x8xf32> to vector<2x8x8xbf16>
    %80 = arith.truncf %63 : vector<2x8x8xf32> to vector<2x8x8xbf16>
    "tpu.trace_start"() <{level = 10 : i32, message = "bqk,bkd->bqd"}> : () -> ()
    %cst_25 = arith.constant dense<0.000000e+00> : vector<2x8x8xf32>
    %81 = tpu.matmul %79, %80, %cst_25 {dimension_numbers = #tpu.dot_dimension_numbers<[2], [1], [1], [2], [0, 0, 0, 1, 1, 2], [0], [0]>} : vector<2x8x8xbf16>, vector<2x8x8xbf16>, vector<2x8x8xf32> -> vector<2x8x8xf32>
    "tpu.trace_stop"() : () -> ()
    %82 = vector.shape_cast %81 : vector<2x8x8xf32> to vector<16x8xf32>
    %83 = arith.truncf %82 : vector<16x8xf32> to vector<16x8xbf16>
    %c16 = arith.constant 16 : index
    %c0_26 = arith.constant 0 : index
    %84 = vector.load %arg2[%c16, %c0_26] : memref<32x32xbf16, #tpu.memory_space<vmem>>, vector<8x32xbf16>
    %cst_27 = arith.constant dense<0.000000e+00> : vector<16x32xf32>
    %85 = tpu.matmul %83, %84, %cst_27 {dimension_numbers = #tpu.dot_dimension_numbers<[1], [0], [0], [1], [0, 0, 1, 1], [], []>} : vector<16x8xbf16>, vector<8x32xbf16>, vector<16x32xf32> -> vector<16x32xf32>
    %86 = arith.addf %60, %85 : vector<16x32xf32>
    %87 = vector.extract_strided_slice %7 {offsets = [0, 0, 24], sizes = [2, 8, 8], strides = [1, 1, 1]} : vector<2x8x96xf32> to vector<2x8x8xf32>
    %88 = vector.extract_strided_slice %7 {offsets = [0, 0, 56], sizes = [2, 8, 8], strides = [1, 1, 1]} : vector<2x8x96xf32> to vector<2x8x8xf32>
    %89 = vector.extract_strided_slice %7 {offsets = [0, 0, 88], sizes = [2, 8, 8], strides = [1, 1, 1]} : vector<2x8x96xf32> to vector<2x8x8xf32>
    %90 = arith.truncf %87 : vector<2x8x8xf32> to vector<2x8x8xbf16>
    %91 = arith.truncf %88 : vector<2x8x8xf32> to vector<2x8x8xbf16>
    "tpu.trace_start"() <{level = 10 : i32, message = "bqd,bkd->bqk"}> : () -> ()
    %cst_28 = arith.constant dense<0.000000e+00> : vector<2x8x8xf32>
    %92 = tpu.matmul %90, %91, %cst_28 {dimension_numbers = #tpu.dot_dimension_numbers<[2], [2], [1], [1], [0, 0, 0, 1, 1, 1], [0], [0]>} : vector<2x8x8xbf16>, vector<2x8x8xbf16>, vector<2x8x8xf32> -> vector<2x8x8xf32>
    "tpu.trace_stop"() : () -> ()
    %cst_29 = arith.constant 0.353553385 : f32
    %93 = vector.broadcast %cst_29 : f32 to vector<2x8x8xf32>
    %94 = arith.mulf %92, %93 : vector<2x8x8xf32>
    %cst_30 = arith.constant dense<0xFF800000> : vector<2x8xf32>
    %95 = vector.multi_reduction <maximumf>, %94, %cst_30 [2] : vector<2x8x8xf32> to vector<2x8xf32>
    %96 = vector.shape_cast %95 : vector<2x8xf32> to vector<2x8x1xf32>
    %97 = vector.broadcast %96 : vector<2x8x1xf32> to vector<2x8x8xf32>
    %98 = arith.subf %94, %97 : vector<2x8x8xf32>
    %99 = math.exp %98 : vector<2x8x8xf32>
    %cst_31 = arith.constant dense<0.000000e+00> : vector<2x8xf32>
    %100 = vector.multi_reduction <add>, %99, %cst_31 [2] : vector<2x8x8xf32> to vector<2x8xf32>
    %101 = vector.shape_cast %100 : vector<2x8xf32> to vector<2x8x1xf32>
    %102 = tpu.reciprocal %101 {approx = true} : vector<2x8x1xf32> -> vector<2x8x1xf32>
    %103 = vector.broadcast %102 : vector<2x8x1xf32> to vector<2x8x8xf32>
    %104 = arith.mulf %99, %103 : vector<2x8x8xf32>
    %105 = arith.truncf %104 : vector<2x8x8xf32> to vector<2x8x8xbf16>
    %106 = arith.truncf %89 : vector<2x8x8xf32> to vector<2x8x8xbf16>
    "tpu.trace_start"() <{level = 10 : i32, message = "bqk,bkd->bqd"}> : () -> ()
    %cst_32 = arith.constant dense<0.000000e+00> : vector<2x8x8xf32>
    %107 = tpu.matmul %105, %106, %cst_32 {dimension_numbers = #tpu.dot_dimension_numbers<[2], [1], [1], [2], [0, 0, 0, 1, 1, 2], [0], [0]>} : vector<2x8x8xbf16>, vector<2x8x8xbf16>, vector<2x8x8xf32> -> vector<2x8x8xf32>
    "tpu.trace_stop"() : () -> ()
    %108 = vector.shape_cast %107 : vector<2x8x8xf32> to vector<16x8xf32>
    %109 = arith.truncf %108 : vector<16x8xf32> to vector<16x8xbf16>
    %c24 = arith.constant 24 : index
    %c0_33 = arith.constant 0 : index
    %110 = vector.load %arg2[%c24, %c0_33] : memref<32x32xbf16, #tpu.memory_space<vmem>>, vector<8x32xbf16>
    %cst_34 = arith.constant dense<0.000000e+00> : vector<16x32xf32>
    %111 = tpu.matmul %109, %110, %cst_34 {dimension_numbers = #tpu.dot_dimension_numbers<[1], [0], [0], [1], [0, 0, 1, 1], [], []>} : vector<16x8xbf16>, vector<8x32xbf16>, vector<16x32xf32> -> vector<16x32xf32>
    %112 = arith.addf %86, %111 : vector<16x32xf32>
    %c0_35 = arith.constant 0 : index
    %c0_36 = arith.constant 0 : index
    %113 = vector.load %arg7[%c0_35, %c0_36] : memref<8x32xf32, #tpu.memory_space<vmem>>, vector<1x32xf32>
    %114 = vector.broadcast %113 : vector<1x32xf32> to vector<16x32xf32>
    %115 = arith.addf %112, %114 : vector<16x32xf32>
    %116 = arith.addf %0, %115 : vector<16x32xf32>
    %c1 = arith.constant 1 : index
    %c0_37 = arith.constant 0 : index
    %117 = vector.load %arg7[%c1, %c0_37] : memref<8x32xf32, #tpu.memory_space<vmem>>, vector<1x32xf32>
    %c2 = arith.constant 2 : index
    %c0_38 = arith.constant 0 : index
    %118 = vector.load %arg7[%c2, %c0_38] : memref<8x32xf32, #tpu.memory_space<vmem>>, vector<1x32xf32>
    %cst_39 = arith.constant dense<0.000000e+00> : vector<16xf32>
    %119 = vector.multi_reduction <add>, %116, %cst_39 [1] : vector<16x32xf32> to vector<16xf32>
    %120 = vector.shape_cast %119 : vector<16xf32> to vector<16x1xf32>
    %cst_40 = arith.constant 3.200000e+01 : f32
    %121 = vector.broadcast %cst_40 : f32 to vector<16x1xf32>
    %122 = arith.divf %120, %121 : vector<16x1xf32>
    %123 = vector.broadcast %122 : vector<16x1xf32> to vector<16x32xf32>
    %124 = arith.subf %116, %123 : vector<16x32xf32>
    %125 = arith.mulf %124, %124 : vector<16x32xf32>
    %cst_41 = arith.constant dense<0.000000e+00> : vector<16xf32>
    %126 = vector.multi_reduction <add>, %125, %cst_41 [1] : vector<16x32xf32> to vector<16xf32>
    %127 = vector.shape_cast %126 : vector<16xf32> to vector<16x1xf32>
    %cst_42 = arith.constant 3.200000e+01 : f32
    %128 = vector.broadcast %cst_42 : f32 to vector<16x1xf32>
    %129 = arith.divf %127, %128 : vector<16x1xf32>
    %130 = vector.broadcast %122 : vector<16x1xf32> to vector<16x32xf32>
    %131 = arith.subf %116, %130 : vector<16x32xf32>
    %cst_43 = arith.constant 9.99999974E-6 : f32
    %132 = vector.broadcast %cst_43 : f32 to vector<16x1xf32>
    %133 = arith.addf %129, %132 : vector<16x1xf32>
    %134 = math.rsqrt %133 : vector<16x1xf32>
    %135 = vector.broadcast %134 : vector<16x1xf32> to vector<16x32xf32>
    %136 = arith.mulf %131, %135 : vector<16x32xf32>
    %137 = vector.broadcast %117 : vector<1x32xf32> to vector<16x32xf32>
    %138 = arith.mulf %136, %137 : vector<16x32xf32>
    %139 = vector.broadcast %118 : vector<1x32xf32> to vector<16x32xf32>
    %140 = arith.addf %138, %139 : vector<16x32xf32>
    %141 = arith.truncf %140 : vector<16x32xf32> to vector<16x32xbf16>
    %c0_44 = arith.constant 0 : index
    %c0_45 = arith.constant 0 : index
    %142 = vector.load %arg3[%c0_44, %c0_45] : memref<32x128xbf16, #tpu.memory_space<vmem>>, vector<32x128xbf16>
    %cst_46 = arith.constant dense<0.000000e+00> : vector<16x128xf32>
    %143 = tpu.matmul %141, %142, %cst_46 {dimension_numbers = #tpu.dot_dimension_numbers<[1], [0], [0], [1], [0, 0, 1, 1], [], []>} : vector<16x32xbf16>, vector<32x128xbf16>, vector<16x128xf32> -> vector<16x128xf32>
    %c0_47 = arith.constant 0 : index
    %c0_48 = arith.constant 0 : index
    %144 = vector.load %arg6[%c0_47, %c0_48] : memref<1x128xf32, #tpu.memory_space<vmem>>, vector<1x128xf32>
    %145 = vector.broadcast %144 : vector<1x128xf32> to vector<16x128xf32>
    %146 = arith.addf %143, %145 : vector<16x128xf32>
    %cst_49 = arith.constant 5.000000e-01 : f32
    %147 = vector.broadcast %cst_49 : f32 to vector<16x128xf32>
    %148 = arith.mulf %147, %146 : vector<16x128xf32>
    %cst_50 = arith.constant 0.707106769 : f32
    %149 = vector.broadcast %cst_50 : f32 to vector<16x128xf32>
    %150 = arith.mulf %146, %149 : vector<16x128xf32>
    %151 = math.erf %150 : vector<16x128xf32>
    %cst_51 = arith.constant 1.000000e+00 : f32
    %152 = vector.broadcast %cst_51 : f32 to vector<16x128xf32>
    %153 = arith.addf %152, %151 : vector<16x128xf32>
    %154 = arith.mulf %148, %153 : vector<16x128xf32>
    %155 = arith.truncf %154 : vector<16x128xf32> to vector<16x128xbf16>
    %c0_52 = arith.constant 0 : index
    %c0_53 = arith.constant 0 : index
    %156 = vector.load %arg4[%c0_52, %c0_53] : memref<128x32xbf16, #tpu.memory_space<vmem>>, vector<128x32xbf16>
    %cst_54 = arith.constant dense<0.000000e+00> : vector<16x32xf32>
    %157 = tpu.matmul %155, %156, %cst_54 {dimension_numbers = #tpu.dot_dimension_numbers<[1], [0], [0], [1], [0, 0, 1, 1], [], []>} : vector<16x128xbf16>, vector<128x32xbf16>, vector<16x32xf32> -> vector<16x32xf32>
    %c3 = arith.constant 3 : index
    %c0_55 = arith.constant 0 : index
    %158 = vector.load %arg7[%c3, %c0_55] : memref<8x32xf32, #tpu.memory_space<vmem>>, vector<1x32xf32>
    %159 = vector.broadcast %158 : vector<1x32xf32> to vector<16x32xf32>
    %160 = arith.addf %157, %159 : vector<16x32xf32>
    %161 = arith.addf %140, %160 : vector<16x32xf32>
    %c4 = arith.constant 4 : index
    %c0_56 = arith.constant 0 : index
    %162 = vector.load %arg7[%c4, %c0_56] : memref<8x32xf32, #tpu.memory_space<vmem>>, vector<1x32xf32>
    %c5 = arith.constant 5 : index
    %c0_57 = arith.constant 0 : index
    %163 = vector.load %arg7[%c5, %c0_57] : memref<8x32xf32, #tpu.memory_space<vmem>>, vector<1x32xf32>
    %cst_58 = arith.constant dense<0.000000e+00> : vector<16xf32>
    %164 = vector.multi_reduction <add>, %161, %cst_58 [1] : vector<16x32xf32> to vector<16xf32>
    %165 = vector.shape_cast %164 : vector<16xf32> to vector<16x1xf32>
    %cst_59 = arith.constant 3.200000e+01 : f32
    %166 = vector.broadcast %cst_59 : f32 to vector<16x1xf32>
    %167 = arith.divf %165, %166 : vector<16x1xf32>
    %168 = vector.broadcast %167 : vector<16x1xf32> to vector<16x32xf32>
    %169 = arith.subf %161, %168 : vector<16x32xf32>
    %170 = arith.mulf %169, %169 : vector<16x32xf32>
    %cst_60 = arith.constant dense<0.000000e+00> : vector<16xf32>
    %171 = vector.multi_reduction <add>, %170, %cst_60 [1] : vector<16x32xf32> to vector<16xf32>
    %172 = vector.shape_cast %171 : vector<16xf32> to vector<16x1xf32>
    %cst_61 = arith.constant 3.200000e+01 : f32
    %173 = vector.broadcast %cst_61 : f32 to vector<16x1xf32>
    %174 = arith.divf %172, %173 : vector<16x1xf32>
    %175 = vector.broadcast %167 : vector<16x1xf32> to vector<16x32xf32>
    %176 = arith.subf %161, %175 : vector<16x32xf32>
    %cst_62 = arith.constant 9.99999974E-6 : f32
    %177 = vector.broadcast %cst_62 : f32 to vector<16x1xf32>
    %178 = arith.addf %174, %177 : vector<16x1xf32>
    %179 = math.rsqrt %178 : vector<16x1xf32>
    %180 = vector.broadcast %179 : vector<16x1xf32> to vector<16x32xf32>
    %181 = arith.mulf %176, %180 : vector<16x32xf32>
    %182 = vector.broadcast %162 : vector<1x32xf32> to vector<16x32xf32>
    %183 = arith.mulf %181, %182 : vector<16x32xf32>
    %184 = vector.broadcast %163 : vector<1x32xf32> to vector<16x32xf32>
    %185 = arith.addf %183, %184 : vector<16x32xf32>
    %c0_63 = arith.constant 0 : index
    %c0_64 = arith.constant 0 : index
    %186 = vector.load %arg8[%c0_63, %c0_64] : memref<16x32xf32, #tpu.memory_space<vmem>>, vector<16x32xf32>
    tpu.vector_store %arg8[%c0_63, %c0_64], %185 {strides = array<i32>} : memref<16x32xf32, #tpu.memory_space<vmem>>, vector<16x32xf32>,
    return
  }
}

</mosaic_0001>

<bundles_post_ra>
// kernel: tpu_custom_call.1
= control target key start
LH: loop header
LB: loop body
LE: loop exit
PB: predicated region body
PF: predicated region fallthrough
CT: control target
= control target key end

     0   :  { %s1441_s0 = inlined_call_operand.vmem [shape: f32[16,32], index: 0, kind: input, shape index: {}]   ;;  %s1442_s1 = inlined_call_operand.vmem [shape: bf16[32,96], index: 1, kind: input, shape index: {}]   ;;  %s1443_s2 = inlined_call_operand.vmem [shape: bf16[32,32], index: 2, kind: input, shape index: {}]   ;;  %s1444_s3 = inlined_call_operand.vmem [shape: bf16[32,128], index: 3, kind: input, shape index: {}]   ;;  %s1445_s4 = inlined_call_operand.vmem [shape: bf16[128,32], index: 4, kind: input, shape index: {}]   ;;  %s1446_s5 = inlined_call_operand.vmem [shape: f32[1,96], index: 5, kind: input, shape index: {}]   ;;  %s1447_s6 = inlined_call_operand.vmem [shape: f32[1,128], index: 6, kind: input, shape index: {}]   ;;  %s1448_s7 = inlined_call_operand.vmem [shape: f32[8,32], index: 7, kind: input, shape index: {}]   ;;  %s1449_s8 = inlined_call_operand.hbm [shape: f32[16,32], index: 8, kind: output, shape index: {}]  }
   0x1   :  { %v1045_v0 = vld [vmem:[%s1442_s1 + $0x8] sm:$0xff]  ;;  %v1044_v1 = vld [vmem:[%s1442_s1] sm:$0xff] }
   0x2   :  { %v1220_v2 = vld [vmem:[%s1441_s0] sm:$0xff]  ;;  %v1225_v3 = vld [vmem:[%s1441_s0 + $0x8] sm:$0xff]  ;;  %64 = vmatpush.bf16.msra.mxu0 %v1045_v0 }
   0x3   :  { %13 = vsyncpa [#allocation3], 0  ;;  %v33_v4 = vpack.c.bf16 %v1225_v3, %v1220_v2  ;;  %vm54_vm0 = vcmask 261120   ;;  %v1071_v5 = vld [vmem:[%s1446_s5] ss:$0 sm:$0xff]  ;;  %s1151_s0 = smov 96  }
   0x4   :  { %s1152_s14 = smov 88   ;;  %s1153_s5 = smov 120   ;;  %vm79_vm1 = vcmask 64512   ;;  %vm154_vm2 = vcmask 1043456  }
   0x5   :  { %s1154_s15 = smov 56   ;;  %s1155_s16 = smov 80  }
   0x6   :  { %65 = vmatpush.bf16.msra.mxu0 %v1044_v1  ;;  %s1156_s17 = smov 64   ;;  %s1157_s18 = smov 112  }
   0x7   :  { %s1158_s19 = smov 48   ;;  %s1159_s20 = smov 72  }
   0x8   :  { %s1160_s25 = smov 104   ;;  %s1161_s26 = smov 40  }
   0x9   :  { %980 = vmatmul.msk.bf16.vlgmr.msra.gmra.mxu0 %vm54_vm0, %v33_v4  ;;  %s1163_s1 = smov [#allocation2]  }
  0x86   :  { %v67_v6 = vpop.f32.mrf.mxu0 }
  0x87   :  { %v68_v7 = vadd.f32 %v1071_v5, %v67_v6 }
  0x89   :  { %v72_v8 = vpack.c.bf16 %v68_v7, %v68_v7 }
  0x8b   :  { %v75_v9 = vunpack.c.l.b16 %v72_v8 }
  0x8d   :  { %v1233_v10 = vpack.c.b16 %v75_v9, %v75_v9 }
  0x8e   :  { %v69_v11 = vpop.f32.mrf.mxu0 }
  0x8f   :  { %v70_v12 = vadd.f32 %v1071_v5, %v69_v11  ;;  %77 = vrot.lane.b32.xlu1 %v1233_v10, %s1151_s0  ;;  %196 = vrot.lane.b32.xlu0 %v1233_v10, %s1152_s14  ;;  %v309_v11 = vld [vmem:[%s1443_s2 + $0x4] sm:$0xf] }
  0x91   :  { %v73_v13 = vpack.c.bf16 %v70_v12, %v70_v12  ;;  %v314_v12 = vsel %vm154_vm2, %v309_v11, 0 }
  0x93   :  { %v100_v14 = vunpack.c.l.b16 %v73_v13 }
  0x95   :  { %v1237_v15 = vpack.c.b16 %v100_v14, %v100_v14 }
  0x97   :  { %219 = vrot.lane.b32.xlu2 %v1237_v15, %s1152_s14  ;;  %102 = vrot.lane.b32.xlu1 %v1237_v15, %s1151_s0  ;;  %s960_s14 = sshll.u32 %s1449_s8, 4  ;;  %s961_s14 = int_to_ptr.hbm [resolvable:$true] %s960_s14 }
  0x98   :  { %194 = vrot.lane.b32.xlu0 %v1233_v10, %s1153_s5 }
  0x9f   :  { %217 = vrot.lane.b32.xlu2 %v1237_v15, %s1153_s5  ;;  %s1165_s5 = smov 8  }
  0xa7   :  { %266 = vrot.lane.b32.xlu2 %v1233_v10, %s1154_s15 }
  0xf1   :  { %v220_v16 = vpop.permute.xlu2 %219 }
  0xf2   :  { %v225_v17 = vsel %vm79_vm1, %v220_v16, 0 }
  0xf3   :  { %234 = vmatpush.bf16.xpose.msra.mxu1 %v225_v17 }
  0xf9   :  { %v218_v18 = vpop.permute.xlu2 %217 }
  0xfa   :  { %986 = vmatmul.msk.bf16.vlgmr.msra.gmra.mxu1 %vm79_vm1, %v218_v18 }
 0x101   :  { %v78_v19 = vpop.permute.xlu1 %77  ;;  %v197_v20 = vpop.permute.xlu0 %196 }
 0x102   :  { %v84_v21 = vsel %vm79_vm1, %v78_v19, 0  ;;  %v202_v22 = vsel %vm79_vm1, %v197_v20, 0  ;;  %v267_v23 = vpop.permute.xlu2 %266 }
 0x103   :  { %93 = vmatpush.bf16.xpose.msra.mxu2 %v84_v21  ;;  %211 = vmatpush.bf16.xpose.msrb.mxu0 %v202_v22  ;;  %v272_v27 = vsel %vm154_vm2, %v267_v23, 0 }
 0x109   :  { %v103_v24 = vpop.permute.xlu1 %102 }
 0x10a   :  { %v195_v25 = vpop.permute.xlu0 %194  ;;  %981 = vmatmul.msk.bf16.vlgmr.msra.gmra.mxu2 %vm79_vm1, %v72_v8  ;;  %v108_v26 = vsel %vm79_vm1, %v103_v24, 0 }
 0x10b   :  { %985 = vmatmul.msk.bf16.vlgmr.msrb.gmra.mxu0 %vm79_vm1, %v195_v25  ;;  %117 = vmatpush.bf16.xpose.msrb.mxu2 %v108_v26 }
 0x10c   :  { %323 = vmatpush.bf16.msra.mxu0 %v314_v12 }
 0x113   :  { %281 = vmatpush.bf16.msra.mxu2 %v272_v27 }
 0x11a   :  { %982 = vmatmul.msk.bf16.vlgmr.msrb.gmra.mxu2 %vm79_vm1, %v73_v13 }
 0x177   :  { %v236_v28 = vpop.f32.mrf.mxu1 }
 0x178   :  { %v241_v41 = vmul.f32 0.35355338, %v236_v28 }
 0x17a   :  { %v245_v43 = vsel %vm79_vm1, %v241_v41, -inf }
 0x17f   :  { %v238_v29 = vpop.f32.mrf.mxu1 }
 0x188   :  { %v213_v30 = vpop.f32.mrf.mxu0 }
 0x189   :  { %v240_v31 = vmul.f32 0.35355338, %v213_v30 }
 0x18b   :  { %v242_v32 = vsel %vm79_vm1, %v240_v31, -inf }
 0x18c   :  { %243 = vmax.xlane.f32.xlu0 %v242_v32 }
 0x18d   :  { %v95_v33 = vpop.f32.mrf.mxu2 }
 0x18e   :  { %v123_v34 = vmul.f32 0.35355338, %v95_v33 }
 0x190   :  { %v215_v35 = vpop.f32.mrf.mxu0  ;;  %v125_v36 = vsel %vm79_vm1, %v123_v34, -inf }
 0x191   :  { %126 = vmax.xlane.f32.xlu2 %v125_v36 }
 0x195   :  { %v97_v37 = vpop.f32.mrf.mxu2 }
 0x19d   :  { %v119_v38 = vpop.f32.mrf.mxu2 }
 0x19e   :  { %v124_v39 = vmul.f32 0.35355338, %v119_v38 }
 0x1a0   :  { %352 = vrot.lane.b32.xlu0 %v1233_v10, %s1155_s16  ;;  %v128_v40 = vsel %vm79_vm1, %v124_v39, -inf }
 0x1a1   :  { %129 = vmax.xlane.f32.xlu2 %v128_v40 }
 0x1a5   :  { %v121_v42 = vpop.f32.mrf.mxu2 }
 0x1a9   :  { %246 = vmax.xlane.f32.xlu2 %v245_v43 }
 0x1c1   :  { %149 = vrot.lane.b32.xlu2 %v1233_v10, %s1156_s17 }
 0x1c9   :  { %171 = vrot.lane.b32.xlu2 %v1237_v15, %s1156_s17 }
 0x1ff   :  { %v244_v44 = vpop.xlane.xlu0 %243 }
 0x200   :  { %v248_v45 = vsub.f32 %v240_v31, %v244_v44 }
 0x202   :  { %v250_v46 = vmul.f32 1.442695, %v248_v45 }
 0x204   :  { %1079 = vpow2.f32 %v250_v46  ;;  %v127_v47 = vpop.xlane.xlu2 %126  ;;  %v193_v46 = vld [vmem:[%s1443_s2] sm:$0xf] }
 0x205   :  { %v131_v48 = vsub.f32 %v123_v34, %v127_v47  ;;  %v334_v47 = vsel %vm154_vm2, %v193_v46, 0 }
 0x206   :  { %343 = vmatpush.bf16.msrb.mxu1 %v334_v47 }
 0x207   :  { %v133_v49 = vmul.f32 1.442695, %v131_v48 }
 0x209   :  { %1081 = vpow2.f32 %v133_v49 }
 0x20a   :  { %v1080_v50 = vpop.eup %1079 }
 0x20b   :  { %v254_v51 = vsel %vm79_vm1, %v1080_v50, 0.0 }
 0x20c   :  { %255 = vadd.xlane.f32.xlu1 %v254_v51 }
 0x20f   :  { %v1082_v52 = vpop.eup %1081 }
 0x210   :  { %v137_v53 = vsel %vm79_vm1, %v1082_v52, 0.0 }
 0x211   :  { %138 = vadd.xlane.f32.xlu0 %v137_v53 }
 0x212   :  { %v353_v54 = vpop.permute.xlu0 %352 }
 0x213   :  { %v358_v55 = vsel %vm79_vm1, %v353_v54, 0 }
 0x214   :  { %367 = vmatpush.bf16.xpose.msrb.mxu2 %v358_v55  ;;  %v130_v56 = vpop.xlane.xlu2 %129 }
 0x215   :  { %v132_v4 = vsub.f32 %v124_v39, %v130_v56 }
 0x217   :  { %v135_v5 = vmul.f32 1.442695, %v132_v4 }
 0x21c   :  { %v247_v57 = vpop.xlane.xlu2 %246 }
 0x21d   :  { %v249_v58 = vsub.f32 %v241_v41, %v247_v57 }
 0x21f   :  { %v252_v59 = vmul.f32 1.442695, %v249_v58 }
 0x221   :  { %1083 = vpow2.f32 %v252_v59 }
 0x222   :  { %1085 = vpow2.f32 %v135_v5 }
 0x224   :  { %v150_v60 = vpop.permute.xlu2 %149 }
 0x225   :  { %350 = vrot.lane.b32.xlu1 %v1233_v10, %s1157_s18  ;;  %287 = vrot.lane.b32.xlu0 %v1237_v15, %s1154_s15  ;;  %v156_v61 = vsel %vm154_vm2, %v150_v60, 0 }
 0x226   :  { %165 = vmatpush.bf16.msra.mxu3 %v156_v61 }
 0x227   :  { %v1084_v62 = vpop.eup %1083 }
 0x228   :  { %v257_v63 = vsel %vm79_vm1, %v1084_v62, 0.0  ;;  %v1086_v6 = vpop.eup %1085 }
 0x229   :  { %258 = vadd.xlane.f32.xlu2 %v257_v63  ;;  %v140_v7 = vsel %vm79_vm1, %v1086_v6, 0.0 }
 0x22c   :  { %v172_v0 = vpop.permute.xlu2 %171 }
 0x22d   :  { %373 = vrot.lane.b32.xlu0 %v1237_v15, %s1157_s18  ;;  %v177_v1 = vsel %vm154_vm2, %v172_v0, 0 }
 0x22e   :  { %186 = vmatpush.bf16.msrb.mxu3 %v177_v1 }
 0x241   :  { %422 = vrot.lane.b32.xlu2 %v1233_v10, %s1158_s19 }
 0x249   :  { %490 = vrot.lane.b32.xlu2 %v1233_v10, %s1159_s20 }
 0x24f   :  { %141 = vadd.xlane.f32.xlu1 %v140_v7 }
 0x251   :  { %513 = vrot.lane.b32.xlu2 %v1237_v15, %s1159_s20 }
 0x268   :  { %375 = vrot.lane.b32.xlu1 %v1237_v15, %s1155_s16 }
 0x27f   :  { %v256_v8 = vpop.xlane.xlu1 %255 }
 0x280   :  { %1087 = vrcp.f32 %v256_v8 }
 0x284   :  { %v139_v9 = vpop.xlane.xlu0 %138 }
 0x285   :  { %1089 = vrcp.f32 %v139_v9 }
 0x286   :  { %v1088_v13 = vpop.eup %1087 }
 0x287   :  { %v262_v14 = vmul.f32 %v1088_v13, %v1080_v50 }
 0x289   :  { %v264_v16 = vpack.c.bf16 %v262_v14, %v262_v14 }
 0x28b   :  { %v1090_v17 = vpop.eup %1089  ;;  %987 = vmatmul.msk.bf16.vlgmr.msra.gmra.mxu2 %vm79_vm1, %v264_v16 }
 0x28c   :  { %v145_v18 = vmul.f32 %v1090_v17, %v1082_v52 }
 0x28e   :  { %v147_v19 = vpack.c.bf16 %v145_v18, %v145_v18 }
 0x290   :  { %983 = vmatmul.msk.bf16.vlgmr.msra.gmra.mxu3 %vm79_vm1, %v147_v19 }
 0x297   :  { %v288_v20 = vpop.permute.xlu0 %287  ;;  %v351_v22 = vpop.permute.xlu1 %350 }
 0x298   :  { %v293_v21 = vsel %vm154_vm2, %v288_v20, 0 }
 0x299   :  { %302 = vmatpush.bf16.msra.mxu3 %v293_v21 }
 0x29b   :  { %991 = vmatmul.msk.bf16.vlgmr.msrb.gmra.mxu2 %vm79_vm1, %v351_v22 }
 0x29c   :  { %v259_v23 = vpop.xlane.xlu2 %258 }
 0x29f   :  { %v374_v37 = vpop.permute.xlu0 %373 }
 0x2a4   :  { %v423_v24 = vpop.permute.xlu2 %422 }
 0x2a5   :  { %v428_v25 = vsel %vm154_vm2, %v423_v24, 0 }
 0x2a6   :  { %437 = vmatpush.bf16.msrb.mxu0 %v428_v25 }
 0x2ac   :  { %v491_v33 = vpop.permute.xlu2 %490 }
 0x2ad   :  { %v496_v36 = vsel %vm79_vm1, %v491_v33, 0 }
 0x2b4   :  { %v514_v51 = vpop.permute.xlu2 %513 }
 0x2b5   :  { %v519_v54 = vsel %vm79_vm1, %v514_v51, 0 }
 0x2c2   :  { %v142_v26 = vpop.xlane.xlu1 %141 }
 0x2c3   :  { %1091 = vrcp.f32 %v142_v26 }
 0x2c4   :  { %1093 = vrcp.f32 %v259_v23 }
 0x2c9   :  { %v1092_v27 = vpop.eup %1091 }
 0x2ca   :  { %v146_v28 = vmul.f32 %v1092_v27, %v1086_v6  ;;  %v1094_v30 = vpop.eup %1093 }
 0x2cb   :  { %v263_v31 = vmul.f32 %v1094_v30, %v1084_v62 }
 0x2cc   :  { %v148_v29 = vpack.c.bf16 %v146_v28, %v146_v28 }
 0x2cd   :  { %v265_v35 = vpack.c.bf16 %v263_v31, %v263_v31 }
 0x2ce   :  { %984 = vmatmul.msk.bf16.vlgmr.msrb.gmra.mxu3 %vm79_vm1, %v148_v29 }
 0x2da   :  { %v376_v32 = vpop.permute.xlu1 %375 }
 0x2db   :  { %v381_v34 = vsel %vm79_vm1, %v376_v32, 0 }
 0x2dc   :  { %390 = vmatpush.bf16.xpose.msrb.mxu3 %v381_v34 }
 0x2de   :  { %988 = vmatmul.msk.bf16.vlgmr.msra.gmra.mxu3 %vm79_vm1, %v265_v35 }
 0x2e4   :  { %505 = vmatpush.bf16.xpose.msra.mxu3 %v496_v36 }
 0x2ee   :  { %992 = vmatmul.msk.bf16.vlgmr.msrb.gmra.mxu3 %vm79_vm1, %v374_v37 }
 0x30e   :  { %v283_v38 = vpop.f32.mrf.mxu2 }
 0x313   :  { %v167_v39 = vpop.f32.mrf.mxu3 }
 0x316   :  { %v285_v40 = vpop.f32.mrf.mxu2 }
 0x31b   :  { %v169_v41 = vpop.f32.mrf.mxu3 }
 0x31e   :  { %v369_v42 = vpop.f32.mrf.mxu2 }
 0x31f   :  { %v396_v43 = vmul.f32 0.35355338, %v369_v42 }
 0x321   :  { %v398_v44 = vsel %vm79_vm1, %v396_v43, -inf }
 0x322   :  { %399 = vmax.xlane.f32.xlu0 %v398_v44 }
 0x326   :  { %v371_v45 = vpop.f32.mrf.mxu2 }
 0x336   :  { %488 = vrot.lane.b32.xlu0 %v1233_v10, %s1160_s25 }
 0x351   :  { %v188_v48 = vpop.f32.mrf.mxu3 }
 0x352   :  { %v192_v49 = vpack.c.bf16 %v188_v48, %v167_v39 }
 0x354   :  { %990 = vmatmul.msk.bf16.vlgmr.msrb.gmra.mxu1 %vm79_vm1, %v192_v49 }
 0x359   :  { %v190_v50 = vpop.f32.mrf.mxu3 }
 0x361   :  { %v304_v52 = vpop.f32.mrf.mxu3 }
 0x362   :  { %v308_v53 = vpack.c.bf16 %v304_v52, %v283_v38 }
 0x364   :  { %989 = vmatmul.msk.bf16.vlgmr.msra.gmra.mxu0 %vm79_vm1, %v308_v53 }
 0x365   :  { %528 = vmatpush.bf16.xpose.msra.mxu0 %v519_v54 }
 0x369   :  { %v306_v55 = vpop.f32.mrf.mxu3 }
 0x371   :  { %v392_v56 = vpop.f32.mrf.mxu3 }
 0x372   :  { %v397_v57 = vmul.f32 0.35355338, %v392_v56 }
 0x374   :  { %v401_v58 = vsel %vm79_vm1, %v397_v57, -inf }
 0x375   :  { %402 = vmax.xlane.f32.xlu2 %v401_v58 }
 0x379   :  { %v394_v59 = vpop.f32.mrf.mxu3 }
 0x395   :  { %v400_v60 = vpop.xlane.xlu0 %399 }
 0x396   :  { %v404_v61 = vsub.f32 %v396_v43, %v400_v60 }
 0x398   :  { %v406_v62 = vmul.f32 1.442695, %v404_v61 }
 0x39a   :  { %1095 = vpow2.f32 %v406_v62 }
 0x3a0   :  { %v1096_v63 = vpop.eup %1095 }
 0x3a1   :  { %v410_v0 = vsel %vm79_vm1, %v1096_v63, 0.0 }
 0x3a2   :  { %411 = vadd.xlane.f32.xlu1 %v410_v0 }
 0x3a8   :  { %v489_v1 = vpop.permute.xlu0 %488 }
 0x3a9   :  { %996 = vmatmul.msk.bf16.vlgmr.msra.gmra.mxu3 %vm79_vm1, %v489_v1 }
 0x3bb   :  { %511 = vrot.lane.b32.xlu1 %v1237_v15, %s1160_s25 }
 0x3c3   :  { %443 = vrot.lane.b32.xlu1 %v1237_v15, %s1158_s19 }
 0x3d1   :  { %v345_v4 = vpop.f32.mrf.mxu1 }
 0x3d9   :  { %v347_v44 = vpop.f32.mrf.mxu1 }
 0x3e1   :  { %v325_v5 = vpop.f32.mrf.mxu0 }
 0x3e2   :  { %v1308_v6 = vadd.f32 %v345_v4, %v325_v5 }
 0x3e8   :  { %v403_v7 = vpop.xlane.xlu2 %402 }
 0x3e9   :  { %v405_v8 = vsub.f32 %v397_v57, %v403_v7  ;;  %v327_v32 = vpop.f32.mrf.mxu0 }
 0x3eb   :  { %v408_v9 = vmul.f32 1.442695, %v405_v8 }
 0x3ed   :  { %1097 = vpow2.f32 %v408_v9 }
 0x3f3   :  { %v1098_v11 = vpop.eup %1097 }
 0x3f4   :  { %v413_v12 = vsel %vm79_vm1, %v1098_v11, 0.0 }
 0x3f5   :  { %414 = vadd.xlane.f32.xlu0 %v413_v12 }
 0x409   :  { %581 = vrot.lane.b32.xlu0 %v1237_v15, %s1161_s26  ;;  %v465_v15 = vld [vmem:[%s1443_s2 + $0x8] sm:$0xf] }
 0x40a   :  { %v470_v25 = vsel %vm154_vm2, %v465_v15, 0  ;;  %v1162_v15 = vmov 32.0  }
 0x40b   :  { %479 = vmatpush.bf16.msra.mxu2 %v470_v25 }
 0x415   :  { %v412_v13 = vpop.xlane.xlu1 %411 }
 0x416   :  { %1099 = vrcp.f32 %v412_v13 }
 0x41c   :  { %v1100_v14 = vpop.eup %1099 }
 0x41d   :  { %v418_v16 = vmul.f32 %v1100_v14, %v1096_v63 }
 0x41f   :  { %v420_v17 = vpack.c.bf16 %v418_v16, %v418_v16  ;;  %v348_v16 = vadd.f32 %v347_v44, %v327_v32 }
 0x421   :  { %993 = vmatmul.msk.bf16.vlgmr.msrb.gmra.mxu0 %vm79_vm1, %v420_v17 }
 0x42c   :  { %v507_v18 = vpop.f32.mrf.mxu3 }
 0x42d   :  { %v534_v19 = vmul.f32 0.35355338, %v507_v18  ;;  %v512_v20 = vpop.permute.xlu1 %511 }
 0x42f   :  { %v536_v21 = vsel %vm79_vm1, %v534_v19, -inf }
 0x430   :  { %537 = vmax.xlane.f32.xlu2 %v536_v21 }
 0x431   :  { %997 = vmatmul.msk.bf16.vlgmr.msra.gmra.mxu0 %vm79_vm1, %v512_v20 }
 0x434   :  { %v509_v22 = vpop.f32.mrf.mxu3 }
 0x435   :  { %v444_v23 = vpop.permute.xlu1 %443 }
 0x436   :  { %v449_v24 = vsel %vm154_vm2, %v444_v23, 0 }
 0x437   :  { %458 = vmatpush.bf16.msra.mxu1 %v449_v24 }
 0x468   :  { %v415_v26 = vpop.xlane.xlu0 %414 }
 0x469   :  { %1101 = vrcp.f32 %v415_v26 }
 0x46f   :  { %v1102_v27 = vpop.eup %1101 }
 0x470   :  { %v419_v28 = vmul.f32 %v1102_v27, %v1098_v11  ;;  %v1072_v11 = vld [vmem:[%s1448_s7] ss:$0 sm:$0xff] }
 0x472   :  { %v421_v29 = vpack.c.bf16 %v419_v28, %v419_v28 }
 0x474   :  { %994 = vmatmul.msk.bf16.vlgmr.msra.gmra.mxu1 %vm79_vm1, %v421_v29 }
 0x47b   :  { %v582_v30 = vpop.permute.xlu0 %581 }
 0x47c   :  { %v587_v31 = vsel %vm154_vm2, %v582_v30, 0 }
 0x47d   :  { %596 = vmatpush.bf16.msrb.mxu2 %v587_v31 }
 0x49e   :  { %v439_v33 = vpop.f32.mrf.mxu0 }
 0x4a3   :  { %v538_v34 = vpop.xlane.xlu2 %537 }
 0x4a4   :  { %v542_v35 = vsub.f32 %v534_v19, %v538_v34 }
 0x4a6   :  { %v544_v36 = vmul.f32 1.442695, %v542_v35  ;;  %v441_v37 = vpop.f32.mrf.mxu0 }
 0x4a8   :  { %1103 = vpow2.f32 %v544_v36 }
 0x4ae   :  { %v1104_v38 = vpop.eup %1103  ;;  %v530_v39 = vpop.f32.mrf.mxu0 }
 0x4af   :  { %v535_v40 = vmul.f32 0.35355338, %v530_v39  ;;  %v548_v41 = vsel %vm79_vm1, %v1104_v38, 0.0  ;;  %v1047_v39 = vld [vmem:[%s1444_s3 + $0x8] sm:$0xff] }
 0x4b0   :  { %549 = vadd.xlane.f32.xlu2 %v548_v41  ;;  %721 = vmatpush.bf16.msrb.mxu0 %v1047_v39 }
 0x4b1   :  { %v539_v42 = vsel %vm79_vm1, %v535_v40, -inf }
 0x4b2   :  { %540 = vmax.xlane.f32.xlu1 %v539_v42 }
 0x4b6   :  { %v532_v43 = vpop.f32.mrf.mxu0 }
 0x4b7   :  { %v1046_v43 = vld [vmem:[%s1444_s3] sm:$0xff]  ;;  %s958_s3 = sshll.u32 %s1163_s1, 4  ;;  %s959_s3 = int_to_ptr.vmem [resolvable:$true] %s958_s3 }
 0x4b8   :  { %722 = vmatpush.bf16.msrb.mxu0 %v1046_v43 }
 0x4f1   :  { %v460_v45 = vpop.f32.mrf.mxu1 }
 0x4f2   :  { %v464_v46 = vpack.c.bf16 %v460_v45, %v439_v33 }
 0x4f4   :  { %995 = vmatmul.msk.bf16.vlgmr.msra.gmra.mxu2 %vm79_vm1, %v464_v46 }
 0x4f9   :  { %v462_v47 = vpop.f32.mrf.mxu1 }
 0x523   :  { %v550_v55 = vpop.xlane.xlu2 %549 }
 0x525   :  { %v541_v48 = vpop.xlane.xlu1 %540 }
 0x526   :  { %v543_v49 = vsub.f32 %v535_v40, %v541_v48 }
 0x528   :  { %v546_v50 = vmul.f32 1.442695, %v543_v49 }
 0x52a   :  { %1105 = vpow2.f32 %v546_v50 }
 0x52b   :  { %1107 = vrcp.f32 %v550_v55 }
 0x530   :  { %v1106_v51 = vpop.eup %1105 }
 0x531   :  { %v551_v52 = vsel %vm79_vm1, %v1106_v51, 0.0  ;;  %v1108_v57 = vpop.eup %1107 }
 0x532   :  { %552 = vadd.xlane.f32.xlu2 %v551_v52  ;;  %v556_v59 = vmul.f32 %v1108_v57, %v1104_v38 }
 0x534   :  { %v558_v0 = vpack.c.bf16 %v556_v59, %v556_v59  ;;  %v1073_v59 = vld [vmem:[%s1448_s7 + $0x1] ss:$0 sm:$0xff] }
 0x54a   :  { %560 = vrot.lane.b32.xlu2 %v1233_v10, %s1161_s26  ;;  %v603_v10 = vld [vmem:[%s1443_s2 + $0xc] sm:$0xf] }
 0x54b   :  { %v608_v1 = vsel %vm154_vm2, %v603_v10, 0 }
 0x54c   :  { %617 = vmatpush.bf16.msrb.mxu3 %v608_v1 }
 0x577   :  { %v481_v53 = vpop.f32.mrf.mxu2 }
 0x578   :  { %v486_v54 = vadd.f32 %v481_v53, %v1308_v6 }
 0x57f   :  { %v483_v4 = vpop.f32.mrf.mxu2 }
 0x580   :  { %v487_v18 = vadd.f32 %v483_v4, %v348_v16 }
 0x5a5   :  { %v553_v56 = vpop.xlane.xlu2 %552 }
 0x5a6   :  { %1109 = vrcp.f32 %v553_v56 }
 0x5a7   :  { %1111 = vrcp.f32 %v1162_v15 }
 0x5ac   :  { %v1110_v58 = vpop.eup %1109 }
 0x5ad   :  { %v557_v60 = vmul.f32 %v1110_v58, %v1106_v51  ;;  %v561_v61 = vpop.permute.xlu2 %560  ;;  %v1112_v25 = vpop.eup %1111 }
 0x5ae   :  { %v566_v62 = vsel %vm154_vm2, %v561_v61, 0  ;;  %v641_v26 = vmul.f32 32.0, %v1112_v25  ;;  %vm645_vm3 = vweird.f32 %v1112_v25 }
 0x5af   :  { %v559_v63 = vpack.c.bf16 %v557_v60, %v557_v60  ;;  %575 = vmatpush.bf16.msrb.mxu1 %v566_v62 }
 0x5b0   :  { %v642_v27 = vsub.f32 1.0, %v641_v26 }
 0x5b1   :  { %999 = vmatmul.msk.bf16.vlgmr.msrb.gmra.mxu2 %vm79_vm1, %v559_v63  ;;  %v1074_v63 = vld [vmem:[%s1448_s7 + $0x2] ss:$0 sm:$0xff] }
 0x5b2   :  { %998 = vmatmul.msk.bf16.vlgmr.msrb.gmra.mxu1 %vm79_vm1, %v558_v0  ;;  %v643_v28 = vmul.f32 %v1112_v25, %v642_v27 }
 0x5b4   :  { %v644_v29 = vadd.f32 %v1112_v25, %v643_v28 }
 0x62f   :  { %v577_v5 = vpop.f32.mrf.mxu1 }
 0x634   :  { %v598_v6 = vpop.f32.mrf.mxu2 }
 0x635   :  { %v602_v7 = vpack.c.bf16 %v598_v6, %v577_v5 }
 0x637   :  { %v579_v8 = vpop.f32.mrf.mxu1  ;;  %1000 = vmatmul.msk.bf16.vlgmr.msrb.gmra.mxu3 %vm79_vm1, %v602_v7  ;;  %v1075_v7 = vld [vmem:[%s1447_s6] ss:$0 sm:$0xff] }
 0x63c   :  { %v600_v9 = vpop.f32.mrf.mxu2 }
 0x6ba   :  { %v619_v12 = vpop.f32.mrf.mxu3 }
 0x6bb   :  { %v624_v13 = vadd.f32 %v619_v12, %v486_v54 }
 0x6bd   :  { %v628_v14 = vadd.f32 %v1072_v11, %v624_v13 }
 0x6bf   :  { %v630_v17 = vadd.f32 %v628_v14, %v1220_v2  ;;  %v1345_v2 = vsel %vm645_vm3, %v1112_v25, %v644_v29  ;;  %v1054_v14 = vld [vmem:[%s1445_s4 + $0x30] sm:$0xff]  ;;  %v1052_v25 = vld [vmem:[%s1445_s4 + $0x20] sm:$0xff] }
 0x6c1   :  { %v634_v19 = vsel %vm54_vm0, %v630_v17, 0.0 }
 0x6c2   :  { %635 = vadd.xlane.f32.xlu1 %v634_v19  ;;  %v621_v20 = vpop.f32.mrf.mxu3 }
 0x6c3   :  { %v625_v21 = vadd.f32 %v621_v20, %v487_v18 }
 0x6c5   :  { %v629_v22 = vadd.f32 %v1072_v11, %v625_v21  ;;  %v1055_v11 = vld [vmem:[%s1445_s4 + $0x38] sm:$0xff]  ;;  %v1053_v21 = vld [vmem:[%s1445_s4 + $0x28] sm:$0xff] }
 0x6c6   :  { %884 = vmatpush.bf16.msra.mxu1 %v1055_v11 }
 0x6c7   :  { %v631_v23 = vadd.f32 %v629_v22, %v1225_v3 }
 0x6c9   :  { %v637_v24 = vsel %vm54_vm0, %v631_v23, 0.0 }
 0x6ca   :  { %638 = vadd.xlane.f32.xlu0 %v637_v24  ;;  %885 = vmatpush.bf16.msra.mxu1 %v1054_v14 }
 0x6ce   :  { %886 = vmatpush.bf16.msra.mxu1 %v1053_v21 }
 0x6d2   :  { %887 = vmatpush.bf16.msra.mxu1 %v1052_v25 }
 0x735   :  { %v636_v30 = vpop.xlane.xlu1 %635 }
 0x736   :  { %v647_v31 = vmul.f32 %v1345_v2, %v636_v30 }
 0x738   :  { %v649_v32 = vsub.f32 %v630_v17, %v647_v31  ;;  %v1051_v31 = vld [vmem:[%s1445_s4 + $0x18] sm:$0xff] }
 0x739   :  { %888 = vmatpush.bf16.msra.mxu1 %v1051_v31 }
 0x73a   :  { %v651_v33 = vmul.f32 %v649_v32, %v649_v32 }
 0x73c   :  { %v653_v3 = vsel %vm54_vm0, %v651_v33, 0.0 }
 0x73d   :  { %654 = vadd.xlane.f32.xlu1 %v653_v3  ;;  %v639_v34 = vpop.xlane.xlu0 %638 }
 0x73e   :  { %v648_v35 = vmul.f32 %v1345_v2, %v639_v34 }
 0x740   :  { %v650_v36 = vsub.f32 %v631_v23, %v648_v35 }
 0x742   :  { %v652_v37 = vmul.f32 %v650_v36, %v650_v36 }
 0x744   :  { %v656_v38 = vsel %vm54_vm0, %v652_v37, 0.0 }
 0x745   :  { %657 = vadd.xlane.f32.xlu1 %v656_v38  ;;  %v1050_v38 = vld [vmem:[%s1445_s4 + $0x10] sm:$0xff] }
 0x746   :  { %889 = vmatpush.bf16.msra.mxu1 %v1050_v38 }
 0x7b0   :  { %v655_v40 = vpop.xlane.xlu1 %654 }
 0x7b1   :  { %v659_v41 = vmul.f32 %v655_v40, %v1345_v2 }
 0x7b3   :  { %v661_v42 = vadd.f32 1e-05, %v659_v41 }
 0x7b5   :  { %1113 = vrsqrt.f32 %v661_v42  ;;  %vm669_vm5 = vweird.f32 %v661_v42 }
 0x7b8   :  { %v658_v44 = vpop.xlane.xlu1 %657 }
 0x7b9   :  { %v660_v45 = vmul.f32 %v658_v44, %v1345_v2 }
 0x7bb   :  { %v1114_v46 = vpop.eup %1113  ;;  %v662_v47 = vadd.f32 1e-05, %v660_v45 }
 0x7bc   :  { %v664_v48 = vmul.f32 %v1114_v46, %v661_v42  ;;  %vm670_vm4 = vweird.f32 %v1114_v46 }
 0x7bd   :  { %1115 = vrsqrt.f32 %v662_v47  ;;  %vm671_vm6 = vmor %vm669_vm5, %vm670_vm4  ;;  %vm679_vm8 = vweird.f32 %v662_v47 }
 0x7be   :  { %v665_v49 = vmul.f32 %v1114_v46, %v664_v48 }
 0x7c0   :  { %v666_v50 = vmul.f32 0.5, %v665_v49 }
 0x7c2   :  { %v667_v51 = vsub.f32 1.5, %v666_v50 }
 0x7c3   :  { %v1116_v52 = vpop.eup %1115 }
 0x7c4   :  { %v668_v53 = vmul.f32 %v1114_v46, %v667_v51  ;;  %v674_v54 = vmul.f32 %v1116_v52, %v662_v47  ;;  %vm680_vm7 = vweird.f32 %v1116_v52 }
 0x7c5   :  { %vm681_vm9 = vmor %vm679_vm8, %vm680_vm7 }
 0x7c6   :  { %v675_v55 = vmul.f32 %v1116_v52, %v674_v54  ;;  %v672_v56 = vsel %vm671_vm6, %v1114_v46, %v668_v53  ;;  %v1049_v46 = vld [vmem:[%s1445_s4 + $0x8] sm:$0xff] }
 0x7c7   :  { %v683_v60 = vmul.f32 %v672_v56, %v649_v32  ;;  %890 = vmatpush.bf16.msra.mxu1 %v1049_v46 }
 0x7c8   :  { %v676_v57 = vmul.f32 0.5, %v675_v55 }
 0x7c9   :  { %v686_v0 = vmul.f32 %v1073_v59, %v683_v60 }
 0x7ca   :  { %v677_v58 = vsub.f32 1.5, %v676_v57 }
 0x7cb   :  { %v1365_v4 = vadd.f32 %v1074_v63, %v686_v0 }
 0x7cc   :  { %v678_v61 = vmul.f32 %v1116_v52, %v677_v58 }
 0x7ce   :  { %v682_v62 = vsel %vm681_vm9, %v1116_v52, %v678_v61  ;;  %v1048_v52 = vld [vmem:[%s1445_s4] sm:$0xff] }
 0x7cf   :  { %v684_v10 = vmul.f32 %v682_v62, %v650_v36  ;;  %891 = vmatpush.bf16.msra.mxu1 %v1048_v52 }
 0x7d1   :  { %v687_v1 = vmul.f32 %v1073_v59, %v684_v10 }
 0x7d3   :  { %v1367_v5 = vadd.f32 %v1074_v63, %v687_v1 }
 0x7d5   :  { %v691_v6 = vpack.c.bf16 %v1367_v5, %v1365_v4 }
 0x7d7   :  { %1009 = vmatmul.msk.bf16.vlgmr.msrb.gmra.mxu0 %vm54_vm0, %v691_v6 }
 0x854   :  { %v724_v8 = vpop.f32.mrf.mxu0 }
 0x855   :  { %v1375_v9 = vadd.f32 %v1075_v7, %v724_v8 }
 0x857   :  { %v1381_v12 = vmul.f32 0.70710677, %v1375_v9 }
 0x859   :  { %v733_v13 = vmul.f32 %v1381_v12, %v1381_v12 }
 0x85b   :  { %v734_v16 = vmin.f32 %v733_v13, 16.0 }
 0x85c   :  { %v726_v17 = vpop.f32.mrf.mxu0 }
 0x85d   :  { %v735_v18 = vmul.f32 2.1237322e-06, %v734_v16  ;;  %v746_v19 = vmul.f32 3.8918573e-05, %v734_v16  ;;  %v1388_v20 = vadd.f32 %v1075_v7, %v726_v17 }
 0x85f   :  { %v736_v22 = vadd.f32 0.00028619796, %v735_v18  ;;  %v747_v23 = vadd.f32 0.001143296, %v746_v19  ;;  %v1394_v24 = vmul.f32 0.70710677, %v1388_v20 }
 0x861   :  { %v748_v15 = vmul.f32 %v747_v23, %v734_v16  ;;  %v773_v26 = vmul.f32 %v1394_v24, %v1394_v24  ;;  %v737_v27 = vmul.f32 %v736_v22, %v734_v16 }
 0x863   :  { %v749_v28 = vadd.f32 0.014752088, %v748_v15  ;;  %v774_v29 = vmin.f32 %v773_v26, 16.0  ;;  %v738_v3 = vadd.f32 0.0036580483, %v737_v27 }
 0x865   :  { %v750_v30 = vmul.f32 %v749_v28, %v734_v16  ;;  %v775_v32 = vmul.f32 2.1237322e-06, %v774_v29  ;;  %v786_v33 = vmul.f32 3.8918573e-05, %v774_v29  ;;  %v739_v41 = vmul.f32 %v738_v3, %v734_v16 }
 0x867   :  { %v751_v34 = vadd.f32 0.112945676, %v750_v30  ;;  %v776_v35 = vadd.f32 0.00028619796, %v775_v32  ;;  %v787_v36 = vadd.f32 0.001143296, %v786_v33 }
 0x868   :  { %v740_v48 = vadd.f32 0.05243302, %v739_v41  ;;  %v1076_v41 = vld [vmem:[%s1448_s7 + $0x3] ss:$0 sm:$0xff] }
 0x869   :  { %v752_v37 = vmul.f32 %v751_v34, %v734_v16  ;;  %v777_v39 = vmul.f32 %v776_v35, %v774_v29  ;;  %v788_v40 = vmul.f32 %v787_v36, %v774_v29  ;;  %v729_v35 = vmul.f32 0.5, %v1375_v9 }
 0x86a   :  { %v741_v54 = vmul.f32 %v740_v48, %v734_v16  ;;  %v730_v36 = vmul.f32 0.5, %v1388_v20 }
 0x86b   :  { %v753_v42 = vadd.f32 0.4994258, %v752_v37  ;;  %v778_v43 = vadd.f32 0.0036580483, %v777_v39  ;;  %v789_v44 = vadd.f32 0.014752088, %v788_v40 }
 0x86c   :  { %v742_v59 = vadd.f32 0.18741608, %v741_v54 }
 0x86d   :  { %v754_v45 = vmul.f32 %v753_v42, %v734_v16  ;;  %v790_v47 = vmul.f32 %v789_v44, %v774_v29  ;;  %v779_v50 = vmul.f32 %v778_v43, %v774_v29 }
 0x86e   :  { %v743_v0 = vmul.f32 %v742_v59, %v734_v16 }
 0x86f   :  { %v755_v49 = vadd.f32 1.0, %v754_v45  ;;  %v791_v51 = vadd.f32 0.112945676, %v790_v47  ;;  %v780_v55 = vadd.f32 0.05243302, %v779_v50 }
 0x870   :  { %v744_v11 = vadd.f32 1.1283791, %v743_v0 }
 0x871   :  { %1117 = vrcp.f32 %v755_v49  ;;  %v792_v53 = vmul.f32 %v791_v51, %v774_v29  ;;  %v781_v61 = vmul.f32 %v780_v55, %v774_v29  ;;  %v767_v1 = vand.u32 2147483648, %v755_v49 }
 0x872   :  { %v765_v7 = vand.u32 2147483647, %v755_v49  ;;  %vm761_vm11 = vweird.f32 %v755_v49  ;;  %v745_v22 = vmul.f32 %v744_v11, %v1381_v12 }
 0x873   :  { %v793_v56 = vadd.f32 0.4994258, %v792_v53  ;;  %v782_v6 = vadd.f32 0.18741608, %v781_v61  ;;  %v768_v17 = vor.u32 1.1754944e-38, %v767_v1 }
 0x874   :  { %vm766_vm13 = vcmp.eq.f32.partialorder %v765_v7, 8.507059e+37 }
 0x875   :  { %v794_v57 = vmul.f32 %v793_v56, %v774_v29  ;;  %v783_v18 = vmul.f32 %v782_v6, %v774_v29 }
 0x877   :  { %v1118_v58 = vpop.eup %1117  ;;  %v795_v62 = vadd.f32 1.0, %v794_v57  ;;  %v784_v16 = vadd.f32 1.1283791, %v783_v18 }
 0x878   :  { %v757_v60 = vmul.f32 %v1118_v58, %v755_v49  ;;  %vm762_vm10 = vweird.f32 %v1118_v58 }
 0x879   :  { %1119 = vrcp.f32 %v795_v62  ;;  %vm763_vm12 = vmor %vm761_vm11, %vm762_vm10  ;;  %v807_v15 = vand.u32 2147483648, %v795_v62  ;;  %v805_v27 = vand.u32 2147483647, %v795_v62  ;;  %vm801_vm15 = vweird.f32 %v795_v62 }
 0x87a   :  { %v758_v63 = vsub.f32 1.0, %v757_v60  ;;  %v785_v32 = vmul.f32 %v784_v16, %v1394_v24 }
 0x87b   :  { %v808_v30 = vor.u32 1.1754944e-38, %v807_v15  ;;  %vm806_vm2 = vcmp.eq.f32.partialorder %v805_v27, 8.507059e+37 }
 0x87c   :  { %v759_v10 = vmul.f32 %v1118_v58, %v758_v63 }
 0x87e   :  { %v760_v8 = vadd.f32 %v1118_v58, %v759_v10 }
 0x87f   :  { %v1120_v13 = vpop.eup %1119 }
 0x880   :  { %v764_v14 = vsel %vm763_vm12, %v1118_v58, %v760_v8  ;;  %v797_v19 = vmul.f32 %v1120_v13, %v795_v62  ;;  %vm802_vm14 = vweird.f32 %v1120_v13  ;;  %v1077_v8 = vld [vmem:[%s1448_s7 + $0x4] ss:$0 sm:$0xff] }
 0x881   :  { %v769_v21 = vsel %vm766_vm13, %v768_v17, %v764_v14  ;;  %vm803_vm1 = vmor %vm801_vm15, %vm802_vm14  ;;  %v1078_v14 = vld [vmem:[%s1448_s7 + $0x5] ss:$0 sm:$0xff]  ;;  %s1164_s7 = smov 128  }
 0x882   :  { %v798_v23 = vsub.f32 1.0, %v797_v19  ;;  %v770_v25 = vmul.f32 %v769_v21, %v745_v22 }
 0x884   :  { %v799_v26 = vmul.f32 %v1120_v13, %v798_v23  ;;  %v1010_v31 = vclamps-f32 %v770_v25, 1.0 }
 0x886   :  { %v800_v28 = vadd.f32 %v1120_v13, %v799_v26  ;;  %v813_v34 = vadd.f32 1.0, %v1010_v31 }
 0x888   :  { %v804_v29 = vsel %vm803_vm1, %v1120_v13, %v800_v28  ;;  %v815_v38 = vmul.f32 %v813_v34, %v729_v35 }
 0x889   :  { %v809_v33 = vsel %vm806_vm2, %v808_v30, %v804_v29 }
 0x88a   :  { %v810_v3 = vmul.f32 %v809_v33, %v785_v32 }
 0x88c   :  { %v1011_v12 = vclamps-f32 %v810_v3, 1.0 }
 0x88e   :  { %v814_v37 = vadd.f32 1.0, %v1011_v12 }
 0x890   :  { %v816_v39 = vmul.f32 %v814_v37, %v730_v36 }
 0x892   :  { %v817_v40 = vpack.c.bf16 %v816_v39, %v815_v38 }
 0x894   :  { %892 = vmatmul.bf16.vlgmr.msra.gmra.mxu1 %v817_v40 }
 0x911   :  { %v893_v24 = vpop.f32.mrf.mxu1 }
 0x912   :  { %v894_v42 = vadd.f32 %v1076_v41, %v893_v24 }
 0x914   :  { %v898_v43 = vadd.f32 %v894_v42, %v1365_v4 }
 0x916   :  { %v902_v44 = vsel %vm54_vm0, %v898_v43, 0.0 }
 0x917   :  { %903 = vadd.xlane.f32.xlu2 %v902_v44 }
 0x919   :  { %v895_v45 = vpop.f32.mrf.mxu1 }
 0x91a   :  { %v896_v9 = vadd.f32 %v1076_v41, %v895_v45 }
 0x91c   :  { %v899_v20 = vadd.f32 %v896_v9, %v1367_v5 }
 0x91e   :  { %v905_v46 = vsel %vm54_vm0, %v899_v20, 0.0 }
 0x91f   :  { %906 = vadd.xlane.f32.xlu1 %v905_v46 }
 0x98a   :  { %v904_v47 = vpop.xlane.xlu2 %903 }
 0x98b   :  { %v908_v48 = vmul.f32 %v904_v47, %v1345_v2 }
 0x98d   :  { %v910_v49 = vsub.f32 %v898_v43, %v908_v48 }
 0x98f   :  { %v912_v50 = vmul.f32 %v910_v49, %v910_v49 }
 0x991   :  { %v914_v51 = vsel %vm54_vm0, %v912_v50, 0.0 }
 0x992   :  { %v907_v52 = vpop.xlane.xlu1 %906  ;;  %915 = vadd.xlane.f32.xlu1 %v914_v51 }
 0x993   :  { %v909_v4 = vmul.f32 %v907_v52, %v1345_v2 }
 0x995   :  { %v911_v53 = vsub.f32 %v899_v20, %v909_v4 }
 0x997   :  { %v913_v54 = vmul.f32 %v911_v53, %v911_v53 }
 0x999   :  { %v917_v55 = vsel %vm54_vm0, %v913_v54, 0.0 }
 0x99a   :  { %918 = vadd.xlane.f32.xlu1 %v917_v55 }
 0xa05   :  { %v916_v5 = vpop.xlane.xlu1 %915 }
 0xa06   :  { %v920_v56 = vmul.f32 %v916_v5, %v1345_v2 }
 0xa08   :  { %v922_v57 = vadd.f32 1e-05, %v920_v56 }
 0xa0a   :  { %1121 = vrsqrt.f32 %v922_v57  ;;  %vm930_vm4 = vweird.f32 %v922_v57 }
 0xa0d   :  { %v919_v58 = vpop.xlane.xlu1 %918 }
 0xa0e   :  { %v921_v59 = vmul.f32 %v919_v58, %v1345_v2 }
 0xa10   :  { %v1122_v60 = vpop.eup %1121  ;;  %v923_v61 = vadd.f32 1e-05, %v921_v59 }
 0xa11   :  { %v925_v62 = vmul.f32 %v1122_v60, %v922_v57  ;;  %vm931_vm3 = vweird.f32 %v1122_v60 }
 0xa12   :  { %1123 = vrsqrt.f32 %v923_v61  ;;  %vm932_vm5 = vmor %vm930_vm4, %vm931_vm3  ;;  %vm940_vm7 = vweird.f32 %v923_v61 }
 0xa13   :  { %v926_v63 = vmul.f32 %v1122_v60, %v925_v62 }
 0xa15   :  { %v927_v0 = vmul.f32 0.5, %v926_v63 }
 0xa17   :  { %v928_v10 = vsub.f32 1.5, %v927_v0 }
 0xa18   :  { %v1124_v1 = vpop.eup %1123 }
 0xa19   :  { %v929_v6 = vmul.f32 %v1122_v60, %v928_v10  ;;  %v935_v7 = vmul.f32 %v1124_v1, %v923_v61  ;;  %vm941_vm6 = vweird.f32 %v1124_v1 }
 0xa1a   :  { %vm942_vm8 = vmor %vm940_vm7, %vm941_vm6 }
 0xa1b   :  { %v933_v11 = vsel %vm932_vm5, %v1122_v60, %v929_v6  ;;  %v936_v13 = vmul.f32 %v1124_v1, %v935_v7 }
 0xa1c   :  { %v944_v2 = vmul.f32 %v933_v11, %v910_v49 }
 0xa1d   :  { %v937_v17 = vmul.f32 0.5, %v936_v13 }
 0xa1e   :  { %v947_v18 = vmul.f32 %v1077_v8, %v944_v2 }
 0xa1f   :  { %v938_v19 = vsub.f32 1.5, %v937_v17 }
 0xa20   :  { %v950_v21 = vadd.f32 %v1078_v14, %v947_v18 }
 0xa21   :  { %v939_v22 = vmul.f32 %v1124_v1, %v938_v19 }
 0xa22   :  { %952 = vst.msk [vmem:[#allocation2] sm:$0xff] %vm54_vm0, %v950_v21 }
 0xa23   :  { %v943_v23 = vsel %vm942_vm8, %v1124_v1, %v939_v22 }
 0xa24   :  { %v945_v16 = vmul.f32 %v943_v23, %v911_v53 }
 0xa26   :  { %v948_v15 = vmul.f32 %v1077_v8, %v945_v16 }
 0xa28   :  { %v951_v25 = vadd.f32 %v1078_v14, %v948_v15 }
 0xa2a   :  { %953 = vst.msk [vmem:[#allocation2 + $0x8] sm:$0xff] %vm54_vm0, %v951_v25 }
 0xa2b   :  { %966 = dma.vmem_to_hbm [thread:$0]  %s959_s3, 256, %s961_s14, [#allocation3], %s1164_s7, %s1164_s7, %s1165_s5  }
 0xa2c   :  { %1149 = dma.done.wait [#allocation3], 256  }
 0xa2d   :  { %1150 = vsyncadd [#allocation3], 4294967040 }
 0xa2e   :  { %971 = vsyncpa [#allocation3], 1 }

</bundles_post_ra>
